<compile_context>
chip_gen: v7x
topology: tpu7x:2x2x1
jax: 0.10.0
libtpu: 0.0.40
codegen_flags: <defaults>
</compile_context>

<pallas_src>
import jax
import jax.numpy as jnp
from jax.experimental import pallas as pl
from jax.experimental.pallas import tpu as pltpu


def _round_up(x: int, m: int) -> int:
    return ((x + m - 1) // m) * m


def _rna_reg_kernel(x_ref, w_ref, b_ref, o_ref, acc_ref):
    # x_ref:   (TB, TD) f32 VMEM tile of the flattened input
    # w_ref:   (1,  TD) f32 VMEM tile of the weight row
    # b_ref:   (1,)     f32 SMEM scalar bias
    # o_ref:   (TB, 1)  f32 output tile (revisited across the k axis)
    # acc_ref: (TB, 128) f32 VMEM lane-partial accumulator
    k = pl.program_id(1)

    @pl.when(k == 0)
    def _init():
        acc_ref[...] = jnp.zeros_like(acc_ref)

    TB, TD = x_ref.shape
    # Lane-partial accumulation: fold the TD lanes down to 128 lanes with pure
    # VPU mul/adds on 128-aligned slices (no reshape, no per-step XLU reduce).
    acc = acc_ref[...]
    for g in range(TD // 128):
        sl = slice(g * 128, (g + 1) * 128)
        acc = acc + x_ref[:, sl] * w_ref[:, sl]
    acc_ref[...] = acc

    @pl.when(k == pl.num_programs(1) - 1)
    def _finalize():
        # One cross-lane reduce per output tile, then bias + sigmoid.
        logits = jnp.sum(acc_ref[...], axis=-1, keepdims=True) + b_ref[0]
        o_ref[...] = jax.nn.sigmoid(logits)


def rna_reg_forward(x, mask, weight, bias, *, tb_max=512, td_max=2048):
    """x: (B, seq_len, vocab_size); mask unused; weight: (D,), bias: ()."""
    del mask  # unused in the reference forward

    B = x.shape[0]
    x_flat = x.reshape(B, -1).astype(jnp.float32)          # (B, D)
    D = x_flat.shape[1]

    # Tile sizes: as large as useful (amortize per-step overhead), padded to
    # (8, 128) multiples, capped so double-buffered x tiles stay well under the
    # default scoped VMEM limit on every generation (v5e 16 MiB ... v7x 64 MiB).
    TB = min(tb_max, _round_up(B, 8))
    TD = min(td_max, _round_up(D, 128))
    B_pad = _round_up(B, TB)
    D_pad = _round_up(D, TD)

    if (B_pad, D_pad) != (B, D):
        # Zero padding is exact: padded columns multiply padded zero weights,
        # padded rows are sliced off below.
        x_flat = jnp.pad(x_flat, ((0, B_pad - B), (0, D_pad - D)))

    w2d = weight.reshape(1, D).astype(jnp.float32)          # (1, D)
    if D_pad != D:
        w2d = jnp.pad(w2d, ((0, 0), (0, D_pad - D)))
    b1 = bias.reshape(1).astype(jnp.float32)                # (1,) scalar in SMEM

    grid = (B_pad // TB, D_pad // TD)

    out = pl.pallas_call(
        _rna_reg_kernel,
        out_shape=jax.ShapeDtypeStruct((B_pad, 1), jnp.float32),
        grid=grid,
        in_specs=[
            pl.BlockSpec((TB, TD), lambda i, k: (i, k)),     # x tile
            pl.BlockSpec((1, TD), lambda i, k: (0, k)),      # weight tile
            pl.BlockSpec(memory_space=pltpu.MemorySpace.SMEM),  # bias scalar
        ],
        out_specs=pl.BlockSpec((TB, 1), lambda i, k: (i, 0)),
        scratch_shapes=[pltpu.VMEM((TB, 128), jnp.float32)],
        compiler_params=pltpu.CompilerParams(
            dimension_semantics=("parallel", "arbitrary")),
    )(x_flat, w2d, b1)

    return out[:B, 0]  # squeeze(-1) -> (B,)


if __name__ == "__main__":
    key = jax.random.PRNGKey(0)

    def run_case(batch, seq_len, vocab_size, subkey, atol):
        D = vocab_size * seq_len
        kx, kw, kb = jax.random.split(subkey, 3)
        x = jax.random.normal(kx, (batch, seq_len, vocab_size), dtype=jnp.float32)
        mask = jnp.ones((batch, seq_len), dtype=jnp.float32)  # unused, as in PyTorch
        bound = 1.0 / (D ** 0.5)
        weight = jax.random.uniform(kw, (D,), minval=-bound, maxval=bound,
                                    dtype=jnp.float32)
        bias = jax.random.uniform(kb, (), minval=-bound, maxval=bound,
                                  dtype=jnp.float32)

        y = rna_reg_forward(x, mask, weight, bias)
        y = jax.block_until_ready(y)

        ref = jax.nn.sigmoid(x.reshape(batch, -1) @ weight + bias)
        assert y.shape == (batch,)
        assert jnp.allclose(y, ref, atol=atol, rtol=atol), (
            f"mismatch: max err {jnp.max(jnp.abs(y - ref))}")

    k1, k2 = jax.random.split(key)
    # Small toy shape (single grid step).
    run_case(batch=2, seq_len=8, vocab_size=5, subkey=k1, atol=1e-5)
    # Module-default seq_len=512 -> D=2560: exercises batch padding and
    # multi-step reduction over the k (feature) grid axis.
    run_case(batch=4, seq_len=512, vocab_size=5, subkey=k2, atol=1e-4)

    print("KERNEL_OK")
</pallas_src>

<mosaic_0001>
module attributes {stable_mosaic.version = 11 : i64} {
  func.func @_rna_reg_kernel(%arg0: i32, %arg1: i32, %arg2: memref<8x128xf32, #tpu.memory_space<vmem>>, %arg3: memref<1x128xf32, #tpu.memory_space<vmem>>, %arg4: memref<1xf32, #tpu.memory_space<smem>>, %arg5: memref<8x1xf32, #tpu.memory_space<vmem>>, %arg6: memref<8x128xf32, #tpu.memory_space<vmem>>) attributes {dimension_semantics = [#tpu.dimension_semantics<parallel>, #tpu.dimension_semantics<arbitrary>], iteration_bounds = array<i64: 1, 1>, scalar_prefetch = 0 : i64, scratch_operands = 1 : i64, tpu.core_type = #tpu.core_type<tc>, window_params = [{transform_indices = @transform_0, window_bounds = array<i64: 8, 128>}, {transform_indices = @transform_1, window_bounds = array<i64: 1, 128>}, {transform_indices = @transform_2, window_bounds = array<i64: 1>}, {transform_indices = @transform_3, window_bounds = array<i64: 8, 1>}]} {
    %c0_i32 = arith.constant 0 : i32
    %0 = arith.cmpi eq, %arg1, %c0_i32 : i32
    %1 = arith.extui %0 : i1 to i32
    %c0_i32_0 = arith.constant 0 : i32
    %2 = arith.cmpi ne, %1, %c0_i32_0 : i32
    scf.if %2 {
      %cst = arith.constant 0.000000e+00 : f32
      %13 = vector.broadcast %cst : f32 to vector<8x128xf32>
      %c0_10 = arith.constant 0 : index
      %c0_11 = arith.constant 0 : index
      %14 = vector.load %arg6[%c0_10, %c0_11] : memref<8x128xf32, #tpu.memory_space<vmem>>, vector<8x128xf32>
      tpu.vector_store %arg6[%c0_10, %c0_11], %13 {strides = array<i32>} : memref<8x128xf32, #tpu.memory_space<vmem>>, vector<8x128xf32>,
    } else {
    }
    %c0 = arith.constant 0 : index
    %c0_1 = arith.constant 0 : index
    %3 = vector.load %arg6[%c0, %c0_1] : memref<8x128xf32, #tpu.memory_space<vmem>>, vector<8x128xf32>
    %c0_2 = arith.constant 0 : index
    %c0_3 = arith.constant 0 : index
    %4 = vector.load %arg2[%c0_2, %c0_3] : memref<8x128xf32, #tpu.memory_space<vmem>>, vector<8x128xf32>
    %c0_4 = arith.constant 0 : index
    %c0_5 = arith.constant 0 : index
    %5 = vector.load %arg3[%c0_4, %c0_5] : memref<1x128xf32, #tpu.memory_space<vmem>>, vector<1x128xf32>
    %6 = vector.broadcast %5 : vector<1x128xf32> to vector<8x128xf32>
    %7 = arith.mulf %4, %6 : vector<8x128xf32>
    %8 = arith.addf %3, %7 : vector<8x128xf32>
    %c0_6 = arith.constant 0 : index
    %c0_7 = arith.constant 0 : index
    %9 = vector.load %arg6[%c0_6, %c0_7] : memref<8x128xf32, #tpu.memory_space<vmem>>, vector<8x128xf32>
    tpu.vector_store %arg6[%c0_6, %c0_7], %8 {strides = array<i32>} : memref<8x128xf32, #tpu.memory_space<vmem>>, vector<8x128xf32>,
    %c0_i32_8 = arith.constant 0 : i32
    %10 = arith.cmpi eq, %arg1, %c0_i32_8 : i32
    %11 = arith.extui %10 : i1 to i32
    %c0_i32_9 = arith.constant 0 : i32
    %12 = arith.cmpi ne, %11, %c0_i32_9 : i32
    scf.if %12 {
      %c0_10 = arith.constant 0 : index
      %c0_11 = arith.constant 0 : index
      %13 = vector.load %arg6[%c0_10, %c0_11] : memref<8x128xf32, #tpu.memory_space<vmem>>, vector<8x128xf32>
      %cst = arith.constant dense<0.000000e+00> : vector<8xf32>
      %14 = vector.multi_reduction <add>, %13, %cst [1] : vector<8x128xf32> to vector<8xf32>
      %15 = vector.shape_cast %14 : vector<8xf32> to vector<8x1xf32>
      %c0_12 = arith.constant 0 : index
      %16 = memref.load %arg4[%c0_12] : memref<1xf32, #tpu.memory_space<smem>>
      %17 = vector.broadcast %16 : f32 to vector<8x1xf32>
      %18 = arith.addf %15, %17 : vector<8x1xf32>
      %19 = arith.negf %18 : vector<8x1xf32>
      %20 = math.exp %19 : vector<8x1xf32>
      %cst_13 = arith.constant 1.000000e+00 : f32
      %21 = vector.broadcast %cst_13 : f32 to vector<8x1xf32>
      %22 = arith.addf %21, %20 : vector<8x1xf32>
      %23 = arith.divf %21, %22 : vector<8x1xf32>
      %c0_14 = arith.constant 0 : index
      %c0_15 = arith.constant 0 : index
      %24 = vector.load %arg5[%c0_14, %c0_15] : memref<8x1xf32, #tpu.memory_space<vmem>>, vector<8x1xf32>
      tpu.vector_store %arg5[%c0_14, %c0_15], %23 {strides = array<i32>} : memref<8x1xf32, #tpu.memory_space<vmem>>, vector<8x1xf32>,
    } else {
    }
    return
  }
  func.func @transform_0(%arg0: i32, %arg1: i32) -> (i32, i32) {
    %c0_i32 = arith.constant 0 : i32
    return %arg0, %arg1 : i32, i32
  }
  func.func @transform_1(%arg0: i32, %arg1: i32) -> (i32, i32) {
    %c0_i32 = arith.constant 0 : i32
    %c0_i32_0 = arith.constant 0 : i32
    return %c0_i32, %arg1 : i32, i32
  }
  func.func @transform_2(%arg0: i32, %arg1: i32) -> i32 {
    %c0_i32 = arith.constant 0 : i32
    %c0_i32_0 = arith.constant 0 : i32
    return %c0_i32 : i32
  }
  func.func @transform_3(%arg0: i32, %arg1: i32) -> (i32, i32) {
    %c0_i32 = arith.constant 0 : i32
    %c0_i32_0 = arith.constant 0 : i32
    return %arg0, %c0_i32 : i32, i32
  }
}

</mosaic_0001>

<bundles_post_ra>
// kernel: tpu_custom_call.1
= control target key start
LH: loop header
LB: loop body
LE: loop exit
PB: predicated region body
PF: predicated region fallthrough
CT: control target
= control target key end

     0   :  { %9 = vsyncpa [#allocation5], 0  ;;  %s97_s12 = smov [#allocation4]   ;;  %s139_s0 = inlined_call_operand.hbm [shape: f32[8,128], index: 0, kind: input, shape index: {}]   ;;  %s140_s1 = inlined_call_operand.vmem [shape: f32[1,128], index: 1, kind: input, shape index: {}]   ;;  %s141_s2 = inlined_call_operand.<no memory space> [shape: f32[1], index: 2, kind: input, shape index: {}]   ;;  %s142_s3 = inlined_call_operand.vmem [shape: f32[8,1], index: 3, kind: output, shape index: {}]  }
   0x1   :  { %s16_s13 = sshll.u32 %s97_s12, 4  ;;  %s73_s16 = scalar_lea.hbm %s139_s0, 128  ;;  %s17_s13 = int_to_ptr.vmem [resolvable:$true] %s16_s13 }
   0x2   :  { %p74_p0 = scmp.ne.s32.totalorder %s139_s0, %s73_s16  ;;  %p77_p1 = scmp.lt.u32.totalorder %s73_s16, %s139_s0 }
   0x4   :  { %p79_p2 = pnand %p77_p1, %p74_p0 }
   0x6   :  { %82 = shalt.err (!%p79_p2)
}
   0x7   :  { %s83_s21 = scalar_lea.vmem %s17_s13, 128  ;;  %p88_p4 = scmp.lt.s32.totalorder %s17_s13, %s17_s13 }
   0x8   :  { %p84_p3 = scmp.ne.s32.totalorder %s17_s13, %s83_s21  ;;  %p89_p5 = scmp.lt.s32.totalorder %s83_s21, %s83_s21 }
   0xa   :  { %p90_p6 = por %p89_p5, %p88_p4 }
   0xc   :  { %p91_p7 = pnand %p90_p6, %p84_p3 }
   0xe   :  { %94 = shalt.err (!%p91_p7)
}
   0xf   :  { %19 = dma.hbm_to_vmem [thread:$0]  %s139_s0, 128, %s17_s13, [#allocation5]  }
  0x10   :  { %95 = dma.done.wait [#allocation5], 128  }
  0x11   :  { %96 = vsyncadd [#allocation5], 4294967168  ;;  %v33_v0 = vld [vmem:[#allocation4] sm:$0xff]  ;;  %v51_v3 = vstv %s141_s2  ;;  %vm59_vm0 = vcmask 7168  }
  0x12   :  { %v66_v1 = vld [vmem:[%s140_s1] ss:$0 sm:$0xff] }
  0x13   :  { %v41_v2 = vmul.f32 %v66_v1, %v33_v0 }
  0x15   :  { %48 = vadd.xlane.f32.xlu0 %v41_v2 }
  0xa2   :  { %v49_v4 = vpop.xlane.xlu0 %48 }
  0xa3   :  { %v52_v5 = vadd.f32 %v51_v3, %v49_v4 }
  0xa5   :  { %v67_v6 = vmul.f32 -1.442695, %v52_v5 }
  0xa7   :  { %69 = vpow2.f32 %v67_v6 }
  0xb1   :  { %v70_v7 = vpop.eup %69 }
  0xb2   :  { %v56_v8 = vadd.f32 1.0, %v70_v7 }
  0xb4   :  { %71 = vrcp.f32 %v56_v8 }
  0xbe   :  { %v72_v9 = vpop.eup %71 }
  0xbf   :  { %60 = vst.msk [vmem:[%s142_s3] sm:$0xff] %vm59_vm0, %v72_v9 }
  0xc0   :  { %65 = vsyncpa [#allocation5], 1 }

</bundles_post_ra>
